<compile_context>
chip_gen: v6e
topology: v6e:2x2x1
jax: 0.10.0
libtpu: 0.0.40
codegen_flags: <defaults>
</compile_context>

<pallas_src>
import jax
import jax.numpy as jnp
from jax.experimental import pallas as pl
from jax.experimental.pallas import tpu as pltpu

IN_FEATURES = 64 * 64    # 4096
OUT_FEATURES = 8


def _round_up(x, m):
    return ((x + m - 1) // m) * m


def _choose_tile_b(B, dtype):
    """Batch tile: multiple of 8 (or == B when B <= 8), >= 2 grid steps when
    B > 8 (v7x dual-TensorCore), capped by VMEM budget per dtype."""
    max_tile = 2048 if jnp.dtype(dtype) == jnp.dtype(jnp.bfloat16) else 1024
    if B <= 8:
        return B
    half = _round_up(-(-B // 2), 8)          # ceil(B/2) rounded up to sublane
    return min(max_tile, half)


def _linear_hardsigmoid_kernel(x_ref, w_ref, b_ref, o_ref):
    # x_ref: (tile_b, 4096)  w_ref: (4096, 8)  b_ref: (1, 8)  o_ref: (tile_b, 8)
    y = jnp.dot(x_ref[...], w_ref[...], preferred_element_type=jnp.float32)
    y = y + b_ref[...]                      # bias already includes the +3.0
    y = jnp.minimum(y, 6.0)                 # torch.clamp_max(v3, 6)
    y = jnp.maximum(y, 0.0)                 # torch.clamp_min(v4, 0)
    o_ref[...] = (y * (1.0 / 6.0)).astype(o_ref.dtype)


def linear_hardsigmoid(x_flat, w, b_plus3):
    """x_flat: (B, 4096) bf16/f32, w: (4096, 8), b_plus3: (1, 8) or (8,) f32.

    Returns (B, 8) f32 = hardsigmoid-style clamp((x @ w) + b_plus3, 0, 6) / 6.
    """
    B = x_flat.shape[0]
    assert x_flat.shape[1] == IN_FEATURES

    # Stream x in its native dtype; only fall back to f32 for exotic dtypes.
    if jnp.dtype(x_flat.dtype) not in (jnp.dtype(jnp.bfloat16),
                                       jnp.dtype(jnp.float32)):
        x_flat = x_flat.astype(jnp.float32)
    compute_dtype = x_flat.dtype

    w = w.astype(compute_dtype)                       # no-op if pre-cast
    b_plus3 = jnp.asarray(b_plus3, jnp.float32).reshape(1, OUT_FEATURES)

    tile_b = _choose_tile_b(B, compute_dtype)
    grid = (pl.cdiv(B, tile_b),)

    itemsize = jnp.dtype(compute_dtype).itemsize
    cost = pl.CostEstimate(
        flops=2 * B * IN_FEATURES * OUT_FEATURES,
        transcendentals=0,
        bytes_accessed=(B * IN_FEATURES * itemsize
                        + IN_FEATURES * OUT_FEATURES * itemsize
                        + OUT_FEATURES * 4
                        + B * OUT_FEATURES * 4),
    )

    return pl.pallas_call(
        _linear_hardsigmoid_kernel,
        out_shape=jax.ShapeDtypeStruct((B, OUT_FEATURES), jnp.float32),
        grid=grid,
        in_specs=[
            pl.BlockSpec((tile_b, IN_FEATURES), lambda i: (i, 0)),
            pl.BlockSpec((IN_FEATURES, OUT_FEATURES), lambda i: (0, 0)),
            pl.BlockSpec((1, OUT_FEATURES), lambda i: (0, 0)),
        ],
        out_specs=pl.BlockSpec((tile_b, OUT_FEATURES), lambda i: (i, 0)),
        compiler_params=pltpu.CompilerParams(
            dimension_semantics=("parallel",),
            vmem_limit_bytes=48 * 1024 * 1024,
        ),
        cost_estimate=cost,
    )(x_flat, w, b_plus3)


def model_forward(x, w, b_plus3):
    # x: any shape (B, ...) whose trailing dims flatten to 4096 features.
    B = x.shape[0]
    x_flat = x.reshape(B, -1)
    return linear_hardsigmoid(x_flat, w, b_plus3)


if __name__ == "__main__":
    key = jax.random.PRNGKey(0)
    kx, kw, kb = jax.random.split(key, 3)

    # nn.Linear(4096, 8)-style init; weight stored transposed as (4096, 8).
    bound = 1.0 / (IN_FEATURES ** 0.5)
    w_f32 = jax.random.uniform(kw, (IN_FEATURES, OUT_FEATURES),
                               minval=-bound, maxval=bound, dtype=jnp.float32)
    b_f32 = jax.random.uniform(kb, (OUT_FEATURES,),
                               minval=-bound, maxval=bound, dtype=jnp.float32)

    # Parameter setup (once, outside the forward path): bf16 streaming weight,
    # bias with the +3 folded in, kept in f32 for the accumulator epilogue.
    w_param = w_f32.astype(jnp.bfloat16)
    b_param = (b_f32 + 3.0).reshape(1, OUT_FEATURES)

    # Small example input: batch=2, flattens to 64*64 = 4096 features.
    # Stored in bf16 so the kernel streams half the bytes (f32 accumulation).
    x = jax.random.normal(kx, (2, 64, 64), dtype=jnp.float32).astype(jnp.bfloat16)

    out = model_forward(x, w_param, b_param)
    out = jax.block_until_ready(out)

    # Reference in plain JAX f32, using the same bf16-rounded x / W values.
    x_ref = x.reshape(2, -1).astype(jnp.float32)
    w_ref = w_param.astype(jnp.float32)
    ref = jnp.clip(x_ref @ w_ref + b_f32 + 3.0, 0.0, 6.0) / 6.0

    assert out.shape == (2, OUT_FEATURES)
    assert bool(jnp.allclose(out, ref, atol=2e-2)), "mismatch vs reference"

    print("KERNEL_OK")
</pallas_src>

<mosaic_0001>
module attributes {stable_mosaic.version = 11 : i64} {
  func.func @_linear_hardsigmoid_kernel(%arg0: i32, %arg1: memref<2x4096xbf16, #tpu.memory_space<vmem>>, %arg2: memref<4096x8xbf16, #tpu.memory_space<vmem>>, %arg3: memref<1x8xf32, #tpu.memory_space<vmem>>, %arg4: memref<2x8xf32, #tpu.memory_space<vmem>>) attributes {dimension_semantics = [#tpu.dimension_semantics<parallel>], iteration_bounds = array<i64: 1>, scalar_prefetch = 0 : i64, scratch_operands = 0 : i64, tpu.core_type = #tpu.core_type<tc>, window_params = [{transform_indices = @transform_0, window_bounds = array<i64: 2, 4096>}, {pipeline_mode = #tpu.pipeline_mode<synchronous>, transform_indices = @transform_1, window_bounds = array<i64: 4096, 8>}, {pipeline_mode = #tpu.pipeline_mode<synchronous>, transform_indices = @transform_2, window_bounds = array<i64: 1, 8>}, {transform_indices = @transform_3, window_bounds = array<i64: 2, 8>}]} {
    %c0 = arith.constant 0 : index
    %c0_0 = arith.constant 0 : index
    %0 = vector.load %arg1[%c0, %c0_0] : memref<2x4096xbf16, #tpu.memory_space<vmem>>, vector<2x4096xbf16>
    %c0_1 = arith.constant 0 : index
    %c0_2 = arith.constant 0 : index
    %1 = vector.load %arg2[%c0_1, %c0_2] : memref<4096x8xbf16, #tpu.memory_space<vmem>>, vector<4096x8xbf16>
    %cst = arith.constant dense<0.000000e+00> : vector<2x8xf32>
    %2 = tpu.matmul %0, %1, %cst {dimension_numbers = #tpu.dot_dimension_numbers<[1], [0], [0], [1], [0, 0, 1, 1], [], []>} : vector<2x4096xbf16>, vector<4096x8xbf16>, vector<2x8xf32> -> vector<2x8xf32>
    %c0_3 = arith.constant 0 : index
    %c0_4 = arith.constant 0 : index
    %3 = vector.load %arg3[%c0_3, %c0_4] : memref<1x8xf32, #tpu.memory_space<vmem>>, vector<1x8xf32>
    %4 = vector.broadcast %3 : vector<1x8xf32> to vector<2x8xf32>
    %5 = arith.addf %2, %4 : vector<2x8xf32>
    %cst_5 = arith.constant 6.000000e+00 : f32
    %6 = vector.broadcast %cst_5 : f32 to vector<2x8xf32>
    %7 = arith.minimumf %5, %6 : vector<2x8xf32>
    %cst_6 = arith.constant 0.000000e+00 : f32
    %8 = vector.broadcast %cst_6 : f32 to vector<2x8xf32>
    %9 = arith.maximumf %7, %8 : vector<2x8xf32>
    %cst_7 = arith.constant 0.166666672 : f32
    %10 = vector.broadcast %cst_7 : f32 to vector<2x8xf32>
    %11 = arith.mulf %9, %10 : vector<2x8xf32>
    %c0_8 = arith.constant 0 : index
    %c0_9 = arith.constant 0 : index
    %12 = vector.load %arg4[%c0_8, %c0_9] : memref<2x8xf32, #tpu.memory_space<vmem>>, vector<2x8xf32>
    tpu.vector_store %arg4[%c0_8, %c0_9], %11 {strides = array<i32>} : memref<2x8xf32, #tpu.memory_space<vmem>>, vector<2x8xf32>,
    return
  }
  func.func @transform_0(%arg0: i32) -> (i32, i32) {
    %c0_i32 = arith.constant 0 : i32
    %c0_i32_0 = arith.constant 0 : i32
    return %arg0, %c0_i32 : i32, i32
  }
  func.func @transform_1(%arg0: i32) -> (i32, i32) {
    %c0_i32 = arith.constant 0 : i32
    %c0_i32_0 = arith.constant 0 : i32
    %c0_i32_1 = arith.constant 0 : i32
    return %c0_i32, %c0_i32_0 : i32, i32
  }
  func.func @transform_2(%arg0: i32) -> (i32, i32) {
    %c0_i32 = arith.constant 0 : i32
    %c0_i32_0 = arith.constant 0 : i32
    %c0_i32_1 = arith.constant 0 : i32
    return %c0_i32, %c0_i32_0 : i32, i32
  }
  func.func @transform_3(%arg0: i32) -> (i32, i32) {
    %c0_i32 = arith.constant 0 : i32
    %c0_i32_0 = arith.constant 0 : i32
    return %arg0, %c0_i32 : i32, i32
  }
}

</mosaic_0001>

<bundles_post_ra>
// kernel: tpu_custom_call.1
= control target key start
LH: loop header
LB: loop body
LE: loop exit
PB: predicated region body
PF: predicated region fallthrough
CT: control target
= control target key end

     0   :  { %v547_v28 = vlaneseq  ;;  %v3859_v36 = vmov 1966171168   ;;  %s4713_s0 = inlined_call_operand.vmem [shape: bf16[2,4096], index: 0, kind: input, shape index: {}]   ;;  %s4714_s1 = inlined_call_operand.vmem [shape: bf16[4096,8], index: 1, kind: input, shape index: {}]   ;;  %s4715_s2 = inlined_call_operand.vmem [shape: f32[1,8], index: 2, kind: input, shape index: {}]   ;;  %s4716_s3 = inlined_call_operand.hbm [shape: f32[2,8], index: 3, kind: output, shape index: {}]  }
   0x1   :  { %v3577_v0 = vld [vmem:[%s4714_s1 + $0x78] sm:$0xff]   ;;  %v3581_v4 = vld [vmem:[%s4714_s1 + $0x70] sm:$0xff]   ;;  %v3585_v8 = vld [vmem:[%s4714_s1 + $0x68] sm:$0xff]   ;;  %v545_v37 = vunpack.c.l.s4 %v3859_v36 }
   0x2   :  { %v3578_v1 = vld [vmem:[%s4714_s1 + $0xf8] sm:$0xff]   ;;  %3223 = vmatprep.subr.bf16.mxu0 %v3577_v0  ;;  %v3582_v5 = vld [vmem:[%s4714_s1 + $0xf0] sm:$0xff]   ;;  %v3586_v9 = vld [vmem:[%s4714_s1 + $0xe8] sm:$0xff]   ;;  %v548_v33 = vshrl.u32 %v547_v28, 7 }
   0x3   :  { %v3579_v2 = vld [vmem:[%s4714_s1 + $0x38] sm:$0xff]   ;;  %3245 = vmatprep.subr.bf16.mxu1 %v3578_v1  ;;  %v3583_v6 = vld [vmem:[%s4714_s1 + $0x30] sm:$0xff]   ;;  %v3587_v10 = vld [vmem:[%s4714_s1 + $0x28] sm:$0xff]   ;;  %v546_v40 = vunpack.c.0.s8 %v545_v37 }
   0x4   :  { %v3580_v3 = vld [vmem:[%s4714_s1 + $0xb8] sm:$0xff]   ;;  %3224 = vmatpush3.bf16.msra.mxu0 %v3579_v2  ;;  %v3584_v7 = vld [vmem:[%s4714_s1 + $0xb0] sm:$0xff]   ;;  %v3588_v11 = vld [vmem:[%s4714_s1 + $0xa8] sm:$0xff]  }
   0x5   :  { %3246 = vmatpush3.bf16.msra.mxu1 %v3580_v3  ;;  %3225 = vmatprep.subr.bf16.mxu0 %v3581_v4  ;;  %v3589_v12 = vld [vmem:[%s4714_s1 + $0x60] sm:$0xff]   ;;  %v3593_v16 = vld [vmem:[%s4714_s1 + $0x58] sm:$0xff]   ;;  %v3597_v20 = vld [vmem:[%s4714_s1 + $0x50] sm:$0xff]   ;;  %v3986_v41 = vsub.s32 %v546_v40, %v548_v33 }
   0x6   :  { %3247 = vmatprep.subr.bf16.mxu1 %v3582_v5  ;;  %v3590_v13 = vld [vmem:[%s4714_s1 + $0xe0] sm:$0xff]   ;;  %v3594_v17 = vld [vmem:[%s4714_s1 + $0xd8] sm:$0xff]   ;;  %v3598_v21 = vld [vmem:[%s4714_s1 + $0xd0] sm:$0xff]  }
   0x7   :  { %v3591_v14 = vld [vmem:[%s4714_s1 + $0x20] sm:$0xff]   ;;  %v3595_v18 = vld [vmem:[%s4714_s1 + $0x18] sm:$0xff]   ;;  %v3599_v22 = vld [vmem:[%s4714_s1 + $0x10] sm:$0xff]  }
   0x8   :  { %3226 = vmatpush3.bf16.msra.mxu0 %v3583_v6  ;;  %v3592_v15 = vld [vmem:[%s4714_s1 + $0xa0] sm:$0xff]   ;;  %v3596_v19 = vld [vmem:[%s4714_s1 + $0x98] sm:$0xff]   ;;  %v3600_v23 = vld [vmem:[%s4714_s1 + $0x90] sm:$0xff]  }
   0x9   :  { %3248 = vmatpush3.bf16.msra.mxu1 %v3584_v7  ;;  %3227 = vmatprep.subr.bf16.mxu0 %v3585_v8  ;;  %v3601_v24 = vld [vmem:[%s4714_s1 + $0x48] sm:$0xff]   ;;  %v3605_v29 = vld [vmem:[%s4714_s1 + $0x40] sm:$0xff]   ;;  %v3610_v35 = vld [vmem:[%s4714_s1 + $0x178] sm:$0xff]  }
   0xa   :  { %3249 = vmatprep.subr.bf16.mxu1 %v3586_v9  ;;  %v3602_v25 = vld [vmem:[%s4714_s1 + $0xc8] sm:$0xff]   ;;  %v3606_v30 = vld [vmem:[%s4714_s1 + $0xc0] sm:$0xff]   ;;  %v3611_v38 = vld [vmem:[%s4714_s1 + $0x1f8] sm:$0xff]  }
   0xb   :  { %v3603_v26 = vld [vmem:[%s4714_s1 + $0x8] sm:$0xff]   ;;  %v3607_v31 = vld [vmem:[%s4714_s1] sm:$0xff]   ;;  %v3612_v47 = vld [vmem:[%s4714_s1 + $0x138] sm:$0xff]  }
   0xc   :  { %3228 = vmatpush3.bf16.msra.mxu0 %v3587_v10  ;;  %v3604_v27 = vld [vmem:[%s4714_s1 + $0x88] sm:$0xff]   ;;  %v3608_v32 = vld [vmem:[%s4714_s1 + $0x80] sm:$0xff]   ;;  %v3613_v49 = vld [vmem:[%s4714_s1 + $0x1b8] sm:$0xff]  }
   0xd   :  { %3250 = vmatpush3.bf16.msra.mxu1 %v3588_v11  ;;  %3229 = vmatprep.subr.bf16.mxu0 %v3589_v12  ;;  %v16_v34 = vld [vmem:[%s4713_s0] sm:$0xff]  ;;  %v3614_v52 = vld [vmem:[%s4714_s1 + $0x170] sm:$0xff]   ;;  %v3618_v58 = vld [vmem:[%s4714_s1 + $0x168] sm:$0xff]  }
   0xe   :  { %3251 = vmatprep.subr.bf16.mxu1 %v3590_v13  ;;  %v543_v39 = vcombine.high %v16_v34, %v16_v34  ;;  %v550_v42 = vrot.slane %v16_v34, %v3986_v41  ;;  %v3615_v54 = vld [vmem:[%s4714_s1 + $0x1f0] sm:$0xff]   ;;  %v3619_v59 = vld [vmem:[%s4714_s1 + $0x1e8] sm:$0xff]   ;;  %v3622_v62 = vld [vmem:[%s4714_s1 + $0x160] sm:$0xff]  }
   0xf   :  { %v3616_v55 = vld [vmem:[%s4714_s1 + $0x130] sm:$0xff]   ;;  %v3620_v60 = vld [vmem:[%s4714_s1 + $0x128] sm:$0xff]   ;;  %v3623_v63 = vld [vmem:[%s4714_s1 + $0x1e0] sm:$0xff]  }
  0x10   :  { %3230 = vmatpush3.bf16.msra.mxu0 %v3591_v14  ;;  %v3990_v43 = vrot.slane %v543_v39, %v3986_v41  ;;  %v558_v44 = vcombine.high %v550_v42, %v550_v42  ;;  %v566_v45 = vrot.slane %v550_v42, %v3986_v41  ;;  %v3617_v57 = vld [vmem:[%s4714_s1 + $0x1b0] sm:$0xff]   ;;  %v3621_v61 = vld [vmem:[%s4714_s1 + $0x1a8] sm:$0xff]   ;;  %v3624_v0 = vld [vmem:[%s4714_s1 + $0x120] sm:$0xff]  }
  0x11   :  { %3252 = vmatpush3.bf16.msra.mxu1 %v3592_v15  ;;  %3231 = vmatprep.subr.bf16.mxu0 %v3593_v16  ;;  %v3625_v1 = vld [vmem:[%s4714_s1 + $0x1a0] sm:$0xff]   ;;  %v3626_v2 = vld [vmem:[%s4714_s1 + $0x158] sm:$0xff]   ;;  %v3630_v6 = vld [vmem:[%s4714_s1 + $0x150] sm:$0xff]  }
  0x12   :  { %3253 = vmatprep.subr.bf16.mxu1 %v3594_v17  ;;  %v559_v46 = vcombine.high %v3990_v43, %v3990_v43  ;;  %v580_v48 = vrot.slane %v558_v44, %v3986_v41  ;;  %v588_v51 = vcombine.high %v566_v45, %v566_v45  ;;  %v3627_v3 = vld [vmem:[%s4714_s1 + $0x1d8] sm:$0xff]   ;;  %v3631_v7 = vld [vmem:[%s4714_s1 + $0x1d0] sm:$0xff]   ;;  %v3634_v10 = vld [vmem:[%s4714_s1 + $0x148] sm:$0xff]  }
  0x13   :  { %v3628_v4 = vld [vmem:[%s4714_s1 + $0x118] sm:$0xff]   ;;  %v3632_v8 = vld [vmem:[%s4714_s1 + $0x110] sm:$0xff]   ;;  %v3635_v11 = vld [vmem:[%s4714_s1 + $0x1c8] sm:$0xff]  }
  0x14   :  { %3232 = vmatpush3.bf16.msra.mxu0 %v3595_v18  ;;  %v587_v50 = vrot.slane %v559_v46, %v3986_v41  ;;  %2339 = vmatprep.mubr.bf16.mxu0 %v580_v48  ;;  %v590_v53 = vcombine.high %v580_v48, %v580_v48  ;;  %v3629_v5 = vld [vmem:[%s4714_s1 + $0x198] sm:$0xff]   ;;  %v3633_v9 = vld [vmem:[%s4714_s1 + $0x190] sm:$0xff]   ;;  %v3636_v12 = vld [vmem:[%s4714_s1 + $0x108] sm:$0xff]   ;;  %v573_v18 = vrot.slane %v3990_v43, %v3986_v41 }
  0x15   :  { %3254 = vmatpush3.bf16.msra.mxu1 %v3596_v19  ;;  %3233 = vmatprep.subr.bf16.mxu0 %v3597_v20  ;;  %v3637_v13 = vld [vmem:[%s4714_s1 + $0x188] sm:$0xff]   ;;  %v3638_v14 = vld [vmem:[%s4714_s1 + $0x140] sm:$0xff]   ;;  %v3642_v19 = vld [vmem:[%s4714_s1 + $0x278] sm:$0xff]  }
  0x16   :  { %3255 = vmatprep.subr.bf16.mxu1 %v3598_v21  ;;  %v591_v56 = vcombine.high %v587_v50, %v587_v50  ;;  %2379 = vmatprep.mubr.bf16.mxu1 %v590_v53  ;;  %v3639_v15 = vld [vmem:[%s4714_s1 + $0x1c0] sm:$0xff]   ;;  %v3643_v20 = vld [vmem:[%s4714_s1 + $0x2f8] sm:$0xff]   ;;  %v3650_v28 = vld [vmem:[%s4714_s1 + $0x268] sm:$0xff]  }
  0x17   :  { %v3640_v16 = vld [vmem:[%s4714_s1 + $0x100] sm:$0xff]   ;;  %v3644_v21 = vld [vmem:[%s4714_s1 + $0x238] sm:$0xff]   ;;  %v3662_v40 = vld [vmem:[%s4714_s1 + $0x250] sm:$0xff]  }
  0x18   :  { %3234 = vmatpush3.bf16.msra.mxu0 %v3599_v22  ;;  %v3641_v17 = vld [vmem:[%s4714_s1 + $0x180] sm:$0xff]   ;;  %v3645_v22 = vld [vmem:[%s4714_s1 + $0x2b8] sm:$0xff]   ;;  %v3663_v42 = vld [vmem:[%s4714_s1 + $0x2d0] sm:$0xff]  }
  0x19   :  { %3256 = vmatpush3.bf16.msra.mxu1 %v3600_v23  ;;  %3235 = vmatprep.subr.bf16.mxu0 %v3601_v24  ;;  %v589_v23 = vcombine.high %v573_v18, %v573_v18  ;;  %v3646_v24 = vld [vmem:[%s4714_s1 + $0x270] sm:$0xff]   ;;  %v3655_v33 = vld [vmem:[%s4714_s1 + $0x2e0] sm:$0xff]   ;;  %v3658_v36 = vld [vmem:[%s4714_s1 + $0x258] sm:$0xff]  }
  0x1a   :  { %3257 = vmatprep.subr.bf16.mxu1 %v3602_v25  ;;  %v3647_v25 = vld [vmem:[%s4714_s1 + $0x2f0] sm:$0xff]   ;;  %v3656_v34 = vld [vmem:[%s4714_s1 + $0x220] sm:$0xff]   ;;  %v3659_v37 = vld [vmem:[%s4714_s1 + $0x2d8] sm:$0xff]  }
  0x1b   :  { %v3661_v39 = vld [vmem:[%s4714_s1 + $0x298] sm:$0xff]   ;;  %v3664_v43 = vld [vmem:[%s4714_s1 + $0x210] sm:$0xff]   ;;  %v17_v46 = vld [vmem:[%s4713_s0 + $0x8] sm:$0xff] }
  0x1c   :  { %3236 = vmatpush3.bf16.msra.mxu0 %v3603_v26  ;;  %v3648_v26 = vld [vmem:[%s4714_s1 + $0x230] sm:$0xff]   ;;  %v599_v48 = vrot.slane %v17_v46, %v3986_v41 }
  0x1d   :  { %3258 = vmatpush3.bf16.msra.mxu1 %v3604_v27  ;;  %3237 = vmatprep.subr.bf16.mxu0 %v3605_v29  ;;  %v3649_v27 = vld [vmem:[%s4714_s1 + $0x2b0] sm:$0xff]   ;;  %v3651_v29 = vld [vmem:[%s4714_s1 + $0x2e8] sm:$0xff]  }
  0x1e   :  { %3259 = vmatprep.subr.bf16.mxu1 %v3606_v30  ;;  %v3652_v30 = vld [vmem:[%s4714_s1 + $0x228] sm:$0xff]   ;;  %v3665_v44 = vld [vmem:[%s4714_s1 + $0x290] sm:$0xff]  }
  0x20   :  { %3238 = vmatpush3.bf16.msra.mxu0 %v3607_v31  ;;  %v3653_v31 = vld [vmem:[%s4714_s1 + $0x2a8] sm:$0xff]  }
  0x21   :  { %3260 = vmatpush3.bf16.msra.mxu1 %v3608_v32  ;;  %3267 = vmatprep.subr.bf16.mxu0 %v3610_v35  ;;  %v3654_v32 = vld [vmem:[%s4714_s1 + $0x260] sm:$0xff]  }
  0x22   :  { %3289 = vmatprep.subr.bf16.mxu1 %v3611_v38  ;;  %v3657_v35 = vld [vmem:[%s4714_s1 + $0x2a0] sm:$0xff]   ;;  %v3660_v38 = vld [vmem:[%s4714_s1 + $0x218] sm:$0xff]  }
  0x23   :  { %2340 = vmatmul.mubr.bf16.vlgmr.msra.gmra.mxu0 %v566_v45  ;;  %v3666_v45 = vld [vmem:[%s4714_s1 + $0x248] sm:$0xff]  }
  0x24   :  { %3268 = vmatpush3.bf16.msra.mxu0 %v3612_v47  ;;  %2380 = vmatmul.mubr.bf16.vlgmr.msra.gmra.mxu1 %v588_v51  ;;  %v3667_v47 = vld [vmem:[%s4714_s1 + $0x2c8] sm:$0xff]  }
  0x25   :  { %3269 = vmatprep.subr.bf16.mxu0 %v3614_v52  ;;  %3290 = vmatpush3.bf16.msra.mxu1 %v3613_v49  ;;  %v592_v49 = vcombine.high %v17_v46, %v17_v46  ;;  %v3669_v51 = vld [vmem:[%s4714_s1 + $0x288] sm:$0xff]   ;;  %v607_v52 = vcombine.high %v599_v48, %v599_v48 }
  0x26   :  { %2419 = vmatprep.mubr.bf16.mxu0 %v587_v50  ;;  %3291 = vmatprep.subr.bf16.mxu1 %v3615_v54  ;;  %v3668_v50 = vld [vmem:[%s4714_s1 + $0x208] sm:$0xff]   ;;  %v3670_v54 = vld [vmem:[%s4714_s1 + $0x240] sm:$0xff]  }
  0x27   :  { %2459 = vmatprep.mubr.bf16.mxu1 %v591_v56  ;;  %v4178_v53 = vrot.slane %v592_v49, %v3986_v41  ;;  %v629_v56 = vrot.slane %v607_v52, %v3986_v41  ;;  %v3717_v46 = vld [vmem:[%s4714_s1 + $0x428] sm:$0xff]   ;;  %v3720_v49 = vld [vmem:[%s4714_s1 + $0x4e0] sm:$0xff]   ;;  %v3723_v52 = vld [vmem:[%s4714_s1 + $0x458] sm:$0xff]  }
  0x28   :  { %3270 = vmatpush3.bf16.msra.mxu0 %v3616_v55  ;;  %v3671_v55 = vld [vmem:[%s4714_s1 + $0x2c0] sm:$0xff]  }
  0x29   :  { %3271 = vmatprep.subr.bf16.mxu0 %v3618_v58  ;;  %3292 = vmatpush3.bf16.msra.mxu1 %v3617_v57  ;;  %v608_v57 = vcombine.high %v4178_v53, %v4178_v53  ;;  %v3672_v58 = vld [vmem:[%s4714_s1 + $0x200] sm:$0xff]  }
  0x2a   :  { %3293 = vmatprep.subr.bf16.mxu1 %v3619_v59  ;;  %v3673_v59 = vld [vmem:[%s4714_s1 + $0x280] sm:$0xff]  }
  0x2c   :  { %3272 = vmatpush3.bf16.msra.mxu0 %v3620_v60  ;;  %v639_v60 = vcombine.high %v629_v56, %v629_v56 }
  0x2d   :  { %3273 = vmatprep.subr.bf16.mxu0 %v3622_v62  ;;  %3294 = vmatpush3.bf16.msra.mxu1 %v3621_v61  ;;  %v615_v61 = vrot.slane %v599_v48, %v3986_v41  ;;  %v3674_v62 = vld [vmem:[%s4714_s1 + $0x378] sm:$0xff]   ;;  %v3719_v48 = vld [vmem:[%s4714_s1 + $0x460] sm:$0xff]  }
  0x2e   :  { %3295 = vmatprep.subr.bf16.mxu1 %v3623_v63  ;;  %v3675_v63 = vld [vmem:[%s4714_s1 + $0x3f8] sm:$0xff]  }
  0x30   :  { %3274 = vmatpush3.bf16.msra.mxu0 %v3624_v0  ;;  %v636_v0 = vrot.slane %v608_v57, %v3986_v41  ;;  %v3728_v57 = vld [vmem:[%s4714_s1 + $0x4d0] sm:$0xff]  }
  0x31   :  { %3275 = vmatprep.subr.bf16.mxu0 %v3626_v2  ;;  %3296 = vmatpush3.bf16.msra.mxu1 %v3625_v1  ;;  %v3676_v1 = vld [vmem:[%s4714_s1 + $0x338] sm:$0xff]  }
  0x32   :  { %3297 = vmatprep.subr.bf16.mxu1 %v3627_v3  ;;  %v3677_v2 = vld [vmem:[%s4714_s1 + $0x3b8] sm:$0xff]   ;;  %v637_v3 = vcombine.high %v615_v61, %v615_v61 }
  0x34   :  { %3276 = vmatpush3.bf16.msra.mxu0 %v3628_v4  ;;  %v3678_v4 = vld [vmem:[%s4714_s1 + $0x370] sm:$0xff]  }
  0x35   :  { %3277 = vmatprep.subr.bf16.mxu0 %v3630_v6  ;;  %3298 = vmatpush3.bf16.msra.mxu1 %v3629_v5  ;;  %v3679_v5 = vld [vmem:[%s4714_s1 + $0x3f0] sm:$0xff]   ;;  %v640_v6 = vcombine.high %v636_v0, %v636_v0 }
  0x36   :  { %3299 = vmatprep.subr.bf16.mxu1 %v3631_v7  ;;  %v3680_v7 = vld [vmem:[%s4714_s1 + $0x330] sm:$0xff]  }
  0x38   :  { %3278 = vmatpush3.bf16.msra.mxu0 %v3632_v8  ;;  %v3681_v8 = vld [vmem:[%s4714_s1 + $0x3b0] sm:$0xff]  }
  0x39   :  { %3279 = vmatprep.subr.bf16.mxu0 %v3634_v10  ;;  %3300 = vmatpush3.bf16.msra.mxu1 %v3633_v9  ;;  %v3682_v9 = vld [vmem:[%s4714_s1 + $0x368] sm:$0xff]  }
  0x3a   :  { %3301 = vmatprep.subr.bf16.mxu1 %v3635_v11  ;;  %v3683_v10 = vld [vmem:[%s4714_s1 + $0x3e8] sm:$0xff]  }
  0x3b   :  { %v3684_v11 = vld [vmem:[%s4714_s1 + $0x328] sm:$0xff]  }
  0x3c   :  { %3280 = vmatpush3.bf16.msra.mxu0 %v3636_v12  ;;  %v3685_v12 = vld [vmem:[%s4714_s1 + $0x3a8] sm:$0xff]  }
  0x3d   :  { %3281 = vmatprep.subr.bf16.mxu0 %v3638_v14  ;;  %3302 = vmatpush3.bf16.msra.mxu1 %v3637_v13  ;;  %v3686_v13 = vld [vmem:[%s4714_s1 + $0x360] sm:$0xff]  }
  0x3e   :  { %3303 = vmatprep.subr.bf16.mxu1 %v3639_v15  ;;  %v3687_v14 = vld [vmem:[%s4714_s1 + $0x3e0] sm:$0xff]  }
  0x3f   :  { %v3688_v15 = vld [vmem:[%s4714_s1 + $0x320] sm:$0xff]  }
  0x40   :  { %3282 = vmatpush3.bf16.msra.mxu0 %v3640_v16  ;;  %v3689_v16 = vld [vmem:[%s4714_s1 + $0x3a0] sm:$0xff]  }
  0x41   :  { %3311 = vmatprep.subr.bf16.mxu0 %v3642_v19  ;;  %3304 = vmatpush3.bf16.msra.mxu1 %v3641_v17  ;;  %v3690_v17 = vld [vmem:[%s4714_s1 + $0x358] sm:$0xff]  }
  0x42   :  { %3333 = vmatprep.subr.bf16.mxu1 %v3643_v20  ;;  %v3692_v19 = vld [vmem:[%s4714_s1 + $0x318] sm:$0xff]  }
  0x43   :  { %2420 = vmatmul.mubr.bf16.vlgmr.msra.gmra.mxu0 %v573_v18  ;;  %v3691_v18 = vld [vmem:[%s4714_s1 + $0x3d8] sm:$0xff]  }
  0x44   :  { %3312 = vmatpush3.bf16.msra.mxu0 %v3644_v21  ;;  %2460 = vmatmul.mubr.bf16.vlgmr.msra.gmra.mxu1 %v589_v23  ;;  %v3693_v20 = vld [vmem:[%s4714_s1 + $0x398] sm:$0xff]   ;;  %v3694_v21 = vld [vmem:[%s4714_s1 + $0x350] sm:$0xff]  }
  0x45   :  { %3313 = vmatprep.subr.bf16.mxu0 %v3646_v24  ;;  %3334 = vmatpush3.bf16.msra.mxu1 %v3645_v22  ;;  %v3695_v22 = vld [vmem:[%s4714_s1 + $0x3d0] sm:$0xff]  }
  0x46   :  { %3335 = vmatprep.subr.bf16.mxu1 %v3647_v25  ;;  %2499 = vmatprep.mubr.bf16.mxu0 %v629_v56  ;;  %v3696_v23 = vld [vmem:[%s4714_s1 + $0x310] sm:$0xff]   ;;  %v3698_v25 = vld [vmem:[%s4714_s1 + $0x348] sm:$0xff]  }
  0x47   :  { %2539 = vmatprep.mubr.bf16.mxu1 %v639_v60  ;;  %v3697_v24 = vld [vmem:[%s4714_s1 + $0x390] sm:$0xff]   ;;  %v3731_v60 = vld [vmem:[%s4714_s1 + $0x448] sm:$0xff]  }
  0x48   :  { %3314 = vmatpush3.bf16.msra.mxu0 %v3648_v26  ;;  %v3699_v26 = vld [vmem:[%s4714_s1 + $0x3c8] sm:$0xff]   ;;  %v3727_v56 = vld [vmem:[%s4714_s1 + $0x450] sm:$0xff]  }
  0x49   :  { %3315 = vmatprep.subr.bf16.mxu0 %v3650_v28  ;;  %3336 = vmatpush3.bf16.msra.mxu1 %v3649_v27  ;;  %v3700_v27 = vld [vmem:[%s4714_s1 + $0x308] sm:$0xff]  }
  0x4a   :  { %3337 = vmatprep.subr.bf16.mxu1 %v3651_v29  ;;  %v3701_v28 = vld [vmem:[%s4714_s1 + $0x388] sm:$0xff]   ;;  %v3702_v29 = vld [vmem:[%s4714_s1 + $0x340] sm:$0xff]  }
  0x4c   :  { %3316 = vmatpush3.bf16.msra.mxu0 %v3652_v30  ;;  %v3703_v30 = vld [vmem:[%s4714_s1 + $0x3c0] sm:$0xff]  }
  0x4d   :  { %3317 = vmatprep.subr.bf16.mxu0 %v3654_v32  ;;  %3338 = vmatpush3.bf16.msra.mxu1 %v3653_v31  ;;  %v3704_v31 = vld [vmem:[%s4714_s1 + $0x300] sm:$0xff]  }
  0x4e   :  { %3339 = vmatprep.subr.bf16.mxu1 %v3655_v33  ;;  %v3705_v32 = vld [vmem:[%s4714_s1 + $0x380] sm:$0xff]   ;;  %v622_v33 = vrot.slane %v4178_v53, %v3986_v41  ;;  %v3724_v53 = vld [vmem:[%s4714_s1 + $0x4d8] sm:$0xff]  }
  0x50   :  { %3318 = vmatpush3.bf16.msra.mxu0 %v3656_v34  ;;  %v3707_v34 = vld [vmem:[%s4714_s1 + $0x478] sm:$0xff]  }
  0x51   :  { %3319 = vmatprep.subr.bf16.mxu0 %v3658_v36  ;;  %3340 = vmatpush3.bf16.msra.mxu1 %v3657_v35  ;;  %v3708_v35 = vld [vmem:[%s4714_s1 + $0x4f8] sm:$0xff]  }
  0x52   :  { %3341 = vmatprep.subr.bf16.mxu1 %v3659_v37  ;;  %v3709_v36 = vld [vmem:[%s4714_s1 + $0x438] sm:$0xff]  }
  0x53   :  { %v3710_v37 = vld [vmem:[%s4714_s1 + $0x4b8] sm:$0xff]  }
  0x54   :  { %3320 = vmatpush3.bf16.msra.mxu0 %v3660_v38  ;;  %v638_v38 = vcombine.high %v622_v33, %v622_v33 }
  0x55   :  { %3321 = vmatprep.subr.bf16.mxu0 %v3662_v40  ;;  %3342 = vmatpush3.bf16.msra.mxu1 %v3661_v39  ;;  %v3711_v39 = vld [vmem:[%s4714_s1 + $0x470] sm:$0xff]  }
  0x56   :  { %3343 = vmatprep.subr.bf16.mxu1 %v3663_v42  ;;  %v3712_v40 = vld [vmem:[%s4714_s1 + $0x4f0] sm:$0xff]  }
  0x57   :  { %v3713_v42 = vld [vmem:[%s4714_s1 + $0x430] sm:$0xff]  }
  0x58   :  { %3322 = vmatpush3.bf16.msra.mxu0 %v3664_v43  ;;  %v3714_v43 = vld [vmem:[%s4714_s1 + $0x4b0] sm:$0xff]  }
  0x59   :  { %3323 = vmatprep.subr.bf16.mxu0 %v3666_v45  ;;  %3344 = vmatpush3.bf16.msra.mxu1 %v3665_v44  ;;  %v3715_v44 = vld [vmem:[%s4714_s1 + $0x468] sm:$0xff]  }
  0x5a   :  { %3345 = vmatprep.subr.bf16.mxu1 %v3667_v47  ;;  %v3716_v45 = vld [vmem:[%s4714_s1 + $0x4e8] sm:$0xff]  }
  0x5b   :  { %v3718_v47 = vld [vmem:[%s4714_s1 + $0x4a8] sm:$0xff]  }
  0x5c   :  { %3324 = vmatpush3.bf16.msra.mxu0 %v3668_v50  ;;  %v3721_v50 = vld [vmem:[%s4714_s1 + $0x420] sm:$0xff]  }
  0x5d   :  { %3325 = vmatprep.subr.bf16.mxu0 %v3670_v54  ;;  %3346 = vmatpush3.bf16.msra.mxu1 %v3669_v51  ;;  %v3722_v51 = vld [vmem:[%s4714_s1 + $0x4a0] sm:$0xff]   ;;  %v3725_v54 = vld [vmem:[%s4714_s1 + $0x418] sm:$0xff]  }
  0x5e   :  { %3347 = vmatprep.subr.bf16.mxu1 %v3671_v55  ;;  %v3726_v55 = vld [vmem:[%s4714_s1 + $0x498] sm:$0xff]  }
  0x60   :  { %3326 = vmatpush3.bf16.msra.mxu0 %v3672_v58  ;;  %v3729_v58 = vld [vmem:[%s4714_s1 + $0x410] sm:$0xff]  }
  0x61   :  { %3355 = vmatprep.subr.bf16.mxu0 %v3674_v62  ;;  %3348 = vmatpush3.bf16.msra.mxu1 %v3673_v59  ;;  %v3730_v59 = vld [vmem:[%s4714_s1 + $0x490] sm:$0xff]   ;;  %v3732_v62 = vld [vmem:[%s4714_s1 + $0x4c8] sm:$0xff]  }
  0x62   :  { %3377 = vmatprep.subr.bf16.mxu1 %v3675_v63 }
  0x63   :  { %2500 = vmatmul.mubr.bf16.vlgmr.msra.gmra.mxu0 %v615_v61  ;;  %v18_v61 = vld [vmem:[%s4713_s0 + $0x10] sm:$0xff] }
  0x64   :  { %3356 = vmatpush3.bf16.msra.mxu0 %v3676_v1  ;;  %2579 = vmatprep.mubr.bf16.mxu0 %v636_v0  ;;  %v648_v63 = vrot.slane %v18_v61, %v3986_v41  ;;  %v641_v0 = vcombine.high %v18_v61, %v18_v61  ;;  %v3733_v1 = vld [vmem:[%s4714_s1 + $0x408] sm:$0xff]  }
  0x65   :  { %2540 = vmatmul.mubr.bf16.vlgmr.msra.gmra.mxu1 %v637_v3  ;;  %3357 = vmatprep.subr.bf16.mxu0 %v3678_v4  ;;  %v3782_v61 = vld [vmem:[%s4714_s1 + $0x628] sm:$0xff]  }
  0x66   :  { %3378 = vmatpush3.bf16.msra.mxu1 %v3677_v2  ;;  %2619 = vmatprep.mubr.bf16.mxu1 %v640_v6  ;;  %v3734_v2 = vld [vmem:[%s4714_s1 + $0x488] sm:$0xff]   ;;  %v656_v3 = vcombine.high %v648_v63, %v648_v63  ;;  %v4384_v4 = vrot.slane %v641_v0, %v3986_v41  ;;  %v3736_v6 = vld [vmem:[%s4714_s1 + $0x4c0] sm:$0xff]  }
  0x67   :  { %3379 = vmatprep.subr.bf16.mxu1 %v3679_v5  ;;  %v3735_v5 = vld [vmem:[%s4714_s1 + $0x440] sm:$0xff]  }
  0x68   :  { %3358 = vmatpush3.bf16.msra.mxu0 %v3680_v7  ;;  %v678_v7 = vrot.slane %v656_v3, %v3986_v41  ;;  %v3785_v0 = vld [vmem:[%s4714_s1 + $0x6e0] sm:$0xff]   ;;  %v3788_v3 = vld [vmem:[%s4714_s1 + $0x658] sm:$0xff]  }
  0x69   :  { %3359 = vmatprep.subr.bf16.mxu0 %v3682_v9  ;;  %v3737_v9 = vld [vmem:[%s4714_s1 + $0x400] sm:$0xff]  }
  0x6a   :  { %3380 = vmatpush3.bf16.msra.mxu1 %v3681_v8  ;;  %v657_v8 = vcombine.high %v4384_v4, %v4384_v4 }
  0x6b   :  { %3381 = vmatprep.subr.bf16.mxu1 %v3683_v10  ;;  %v3738_v10 = vld [vmem:[%s4714_s1 + $0x480] sm:$0xff]  }
  0x6c   :  { %3360 = vmatpush3.bf16.msra.mxu0 %v3684_v11  ;;  %v688_v11 = vcombine.high %v678_v7, %v678_v7 }
  0x6d   :  { %3361 = vmatprep.subr.bf16.mxu0 %v3686_v13  ;;  %v3739_v13 = vld [vmem:[%s4714_s1 + $0x578] sm:$0xff]  }
  0x6e   :  { %3382 = vmatpush3.bf16.msra.mxu1 %v3685_v12  ;;  %v664_v12 = vrot.slane %v648_v63, %v3986_v41  ;;  %v3784_v63 = vld [vmem:[%s4714_s1 + $0x660] sm:$0xff]  }
  0x6f   :  { %3383 = vmatprep.subr.bf16.mxu1 %v3687_v14  ;;  %v3740_v14 = vld [vmem:[%s4714_s1 + $0x5f8] sm:$0xff]  }
  0x70   :  { %3362 = vmatpush3.bf16.msra.mxu0 %v3688_v15  ;;  %v685_v15 = vrot.slane %v657_v8, %v3986_v41  ;;  %v3793_v8 = vld [vmem:[%s4714_s1 + $0x6d0] sm:$0xff]  }
  0x71   :  { %3363 = vmatprep.subr.bf16.mxu0 %v3690_v17  ;;  %v3742_v17 = vld [vmem:[%s4714_s1 + $0x5b8] sm:$0xff]  }
  0x72   :  { %3384 = vmatpush3.bf16.msra.mxu1 %v3689_v16  ;;  %v3741_v16 = vld [vmem:[%s4714_s1 + $0x538] sm:$0xff]  }
  0x73   :  { %3385 = vmatprep.subr.bf16.mxu1 %v3691_v18  ;;  %v686_v18 = vcombine.high %v664_v12, %v664_v12 }
  0x74   :  { %3364 = vmatpush3.bf16.msra.mxu0 %v3692_v19  ;;  %v3743_v19 = vld [vmem:[%s4714_s1 + $0x570] sm:$0xff]  }
  0x75   :  { %3365 = vmatprep.subr.bf16.mxu0 %v3694_v21  ;;  %v689_v21 = vcombine.high %v685_v15, %v685_v15 }
  0x76   :  { %3386 = vmatpush3.bf16.msra.mxu1 %v3693_v20  ;;  %v3744_v20 = vld [vmem:[%s4714_s1 + $0x5f0] sm:$0xff]  }
  0x77   :  { %3387 = vmatprep.subr.bf16.mxu1 %v3695_v22  ;;  %v3745_v22 = vld [vmem:[%s4714_s1 + $0x530] sm:$0xff]  }
  0x78   :  { %3366 = vmatpush3.bf16.msra.mxu0 %v3696_v23  ;;  %v3746_v23 = vld [vmem:[%s4714_s1 + $0x5b0] sm:$0xff]  }
  0x79   :  { %3367 = vmatprep.subr.bf16.mxu0 %v3698_v25  ;;  %v3748_v25 = vld [vmem:[%s4714_s1 + $0x5e8] sm:$0xff]  }
  0x7a   :  { %3388 = vmatpush3.bf16.msra.mxu1 %v3697_v24  ;;  %v3747_v24 = vld [vmem:[%s4714_s1 + $0x568] sm:$0xff]  }
  0x7b   :  { %3389 = vmatprep.subr.bf16.mxu1 %v3699_v26  ;;  %v3749_v26 = vld [vmem:[%s4714_s1 + $0x528] sm:$0xff]  }
  0x7c   :  { %3368 = vmatpush3.bf16.msra.mxu0 %v3700_v27  ;;  %v3750_v27 = vld [vmem:[%s4714_s1 + $0x5a8] sm:$0xff]  }
  0x7d   :  { %3369 = vmatprep.subr.bf16.mxu0 %v3702_v29  ;;  %v3752_v29 = vld [vmem:[%s4714_s1 + $0x5e0] sm:$0xff]  }
  0x7e   :  { %3390 = vmatpush3.bf16.msra.mxu1 %v3701_v28  ;;  %v3751_v28 = vld [vmem:[%s4714_s1 + $0x560] sm:$0xff]  }
  0x7f   :  { %3391 = vmatprep.subr.bf16.mxu1 %v3703_v30  ;;  %v3753_v30 = vld [vmem:[%s4714_s1 + $0x520] sm:$0xff]  }
  0x80   :  { %3370 = vmatpush3.bf16.msra.mxu0 %v3704_v31  ;;  %v3754_v31 = vld [vmem:[%s4714_s1 + $0x5a0] sm:$0xff]  }
  0x81   :  { %3399 = vmatprep.subr.bf16.mxu0 %v3707_v34  ;;  %v3757_v34 = vld [vmem:[%s4714_s1 + $0x518] sm:$0xff]  }
  0x82   :  { %3392 = vmatpush3.bf16.msra.mxu1 %v3705_v32  ;;  %v3755_v32 = vld [vmem:[%s4714_s1 + $0x558] sm:$0xff]  }
  0x83   :  { %2580 = vmatmul.mubr.bf16.vlgmr.msra.gmra.mxu0 %v622_v33  ;;  %3421 = vmatprep.subr.bf16.mxu1 %v3708_v35  ;;  %v3756_v33 = vld [vmem:[%s4714_s1 + $0x5d8] sm:$0xff]  }
  0x84   :  { %3400 = vmatpush3.bf16.msra.mxu0 %v3709_v36  ;;  %2659 = vmatprep.mubr.bf16.mxu0 %v678_v7  ;;  %v3758_v35 = vld [vmem:[%s4714_s1 + $0x598] sm:$0xff]   ;;  %v3759_v36 = vld [vmem:[%s4714_s1 + $0x550] sm:$0xff]  }
  0x85   :  { %2620 = vmatmul.mubr.bf16.vlgmr.msra.gmra.mxu1 %v638_v38  ;;  %3401 = vmatprep.subr.bf16.mxu0 %v3711_v39  ;;  %v3761_v38 = vld [vmem:[%s4714_s1 + $0x510] sm:$0xff]  }
  0x86   :  { %3422 = vmatpush3.bf16.msra.mxu1 %v3710_v37  ;;  %2699 = vmatprep.mubr.bf16.mxu1 %v688_v11  ;;  %v3760_v37 = vld [vmem:[%s4714_s1 + $0x5d0] sm:$0xff]   ;;  %v3796_v11 = vld [vmem:[%s4714_s1 + $0x648] sm:$0xff]  }
  0x87   :  { %3423 = vmatprep.subr.bf16.mxu1 %v3712_v40  ;;  %v3762_v39 = vld [vmem:[%s4714_s1 + $0x590] sm:$0xff]   ;;  %v3763_v40 = vld [vmem:[%s4714_s1 + $0x548] sm:$0xff]  }
  0x88   :  { %3402 = vmatpush3.bf16.msra.mxu0 %v3713_v42  ;;  %v3764_v42 = vld [vmem:[%s4714_s1 + $0x5c8] sm:$0xff]   ;;  %v3792_v7 = vld [vmem:[%s4714_s1 + $0x650] sm:$0xff]  }
  0x89   :  { %3403 = vmatprep.subr.bf16.mxu0 %v3715_v44  ;;  %v3766_v44 = vld [vmem:[%s4714_s1 + $0x588] sm:$0xff]  }
  0x8a   :  { %3424 = vmatpush3.bf16.msra.mxu1 %v3714_v43  ;;  %v3765_v43 = vld [vmem:[%s4714_s1 + $0x508] sm:$0xff]  }
  0x8b   :  { %3425 = vmatprep.subr.bf16.mxu1 %v3716_v45  ;;  %v3767_v45 = vld [vmem:[%s4714_s1 + $0x540] sm:$0xff]  }
  0x8c   :  { %3404 = vmatpush3.bf16.msra.mxu0 %v3717_v46  ;;  %v3768_v46 = vld [vmem:[%s4714_s1 + $0x5c0] sm:$0xff]  }
  0x8d   :  { %3405 = vmatprep.subr.bf16.mxu0 %v3719_v48  ;;  %v3770_v48 = vld [vmem:[%s4714_s1 + $0x580] sm:$0xff]  }
  0x8e   :  { %3426 = vmatpush3.bf16.msra.mxu1 %v3718_v47  ;;  %v3769_v47 = vld [vmem:[%s4714_s1 + $0x500] sm:$0xff]  }
  0x8f   :  { %3427 = vmatprep.subr.bf16.mxu1 %v3720_v49  ;;  %v671_v49 = vrot.slane %v4384_v4, %v3986_v41  ;;  %v3789_v4 = vld [vmem:[%s4714_s1 + $0x6d8] sm:$0xff]  }
  0x90   :  { %3406 = vmatpush3.bf16.msra.mxu0 %v3721_v50  ;;  %v3772_v50 = vld [vmem:[%s4714_s1 + $0x678] sm:$0xff]  }
  0x91   :  { %3407 = vmatprep.subr.bf16.mxu0 %v3723_v52  ;;  %v3774_v52 = vld [vmem:[%s4714_s1 + $0x638] sm:$0xff]  }
  0x92   :  { %3428 = vmatpush3.bf16.msra.mxu1 %v3722_v51  ;;  %v3773_v51 = vld [vmem:[%s4714_s1 + $0x6f8] sm:$0xff]  }
  0x93   :  { %3429 = vmatprep.subr.bf16.mxu1 %v3724_v53  ;;  %v3775_v53 = vld [vmem:[%s4714_s1 + $0x6b8] sm:$0xff]  }
  0x94   :  { %3408 = vmatpush3.bf16.msra.mxu0 %v3725_v54  ;;  %v687_v54 = vcombine.high %v671_v49, %v671_v49 }
  0x95   :  { %3409 = vmatprep.subr.bf16.mxu0 %v3727_v56  ;;  %v3777_v56 = vld [vmem:[%s4714_s1 + $0x6f0] sm:$0xff]  }
  0x96   :  { %3430 = vmatpush3.bf16.msra.mxu1 %v3726_v55  ;;  %v3776_v55 = vld [vmem:[%s4714_s1 + $0x670] sm:$0xff]  }
  0x97   :  { %3431 = vmatprep.subr.bf16.mxu1 %v3728_v57  ;;  %v3778_v57 = vld [vmem:[%s4714_s1 + $0x630] sm:$0xff]  }
  0x98   :  { %3410 = vmatpush3.bf16.msra.mxu0 %v3729_v58  ;;  %v3779_v58 = vld [vmem:[%s4714_s1 + $0x6b0] sm:$0xff]  }
  0x99   :  { %3411 = vmatprep.subr.bf16.mxu0 %v3731_v60  ;;  %v3781_v60 = vld [vmem:[%s4714_s1 + $0x6e8] sm:$0xff]  }
  0x9a   :  { %3432 = vmatpush3.bf16.msra.mxu1 %v3730_v59  ;;  %v3780_v59 = vld [vmem:[%s4714_s1 + $0x668] sm:$0xff]  }
  0x9b   :  { %3433 = vmatprep.subr.bf16.mxu1 %v3732_v62  ;;  %v3783_v62 = vld [vmem:[%s4714_s1 + $0x6a8] sm:$0xff]  }
  0x9c   :  { %3412 = vmatpush3.bf16.msra.mxu0 %v3733_v1  ;;  %v3786_v1 = vld [vmem:[%s4714_s1 + $0x620] sm:$0xff]  }
  0x9d   :  { %3413 = vmatprep.subr.bf16.mxu0 %v3735_v5  ;;  %v3790_v5 = vld [vmem:[%s4714_s1 + $0x618] sm:$0xff]  }
  0x9e   :  { %3434 = vmatpush3.bf16.msra.mxu1 %v3734_v2  ;;  %v3787_v2 = vld [vmem:[%s4714_s1 + $0x6a0] sm:$0xff]  }
  0x9f   :  { %3435 = vmatprep.subr.bf16.mxu1 %v3736_v6  ;;  %v3791_v6 = vld [vmem:[%s4714_s1 + $0x698] sm:$0xff]  }
  0xa0   :  { %3414 = vmatpush3.bf16.msra.mxu0 %v3737_v9  ;;  %v3794_v9 = vld [vmem:[%s4714_s1 + $0x610] sm:$0xff]  }
  0xa1   :  { %3443 = vmatprep.subr.bf16.mxu0 %v3739_v13  ;;  %v3797_v13 = vld [vmem:[%s4714_s1 + $0x6c8] sm:$0xff]  }
  0xa2   :  { %3436 = vmatpush3.bf16.msra.mxu1 %v3738_v10  ;;  %v3795_v10 = vld [vmem:[%s4714_s1 + $0x690] sm:$0xff]  }
  0xa3   :  { %2660 = vmatmul.mubr.bf16.vlgmr.msra.gmra.mxu0 %v664_v12  ;;  %3465 = vmatprep.subr.bf16.mxu1 %v3740_v14  ;;  %v19_v12 = vld [vmem:[%s4713_s0 + $0x18] sm:$0xff] }
  0xa4   :  { %3444 = vmatpush3.bf16.msra.mxu0 %v3741_v16  ;;  %2739 = vmatprep.mubr.bf16.mxu0 %v685_v15  ;;  %v697_v14 = vrot.slane %v19_v12, %v3986_v41  ;;  %v690_v15 = vcombine.high %v19_v12, %v19_v12  ;;  %v3798_v16 = vld [vmem:[%s4714_s1 + $0x608] sm:$0xff]  }
  0xa5   :  { %2700 = vmatmul.mubr.bf16.vlgmr.msra.gmra.mxu1 %v686_v18  ;;  %3445 = vmatprep.subr.bf16.mxu0 %v3743_v19 }
  0xa6   :  { %3466 = vmatpush3.bf16.msra.mxu1 %v3742_v17  ;;  %2779 = vmatprep.mubr.bf16.mxu1 %v689_v21  ;;  %v3800_v17 = vld [vmem:[%s4714_s1 + $0x640] sm:$0xff]   ;;  %v705_v18 = vcombine.high %v697_v14, %v697_v14  ;;  %v4590_v19 = vrot.slane %v690_v15, %v3986_v41 }
  0xa7   :  { %3467 = vmatprep.subr.bf16.mxu1 %v3744_v20  ;;  %v3799_v20 = vld [vmem:[%s4714_s1 + $0x688] sm:$0xff]   ;;  %v3801_v21 = vld [vmem:[%s4714_s1 + $0x6c0] sm:$0xff]  }
  0xa8   :  { %3446 = vmatpush3.bf16.msra.mxu0 %v3745_v22  ;;  %v727_v22 = vrot.slane %v705_v18, %v3986_v41 }
  0xa9   :  { %3447 = vmatprep.subr.bf16.mxu0 %v3747_v24  ;;  %v3802_v24 = vld [vmem:[%s4714_s1 + $0x600] sm:$0xff]  }
  0xaa   :  { %3468 = vmatpush3.bf16.msra.mxu1 %v3746_v23  ;;  %v706_v23 = vcombine.high %v4590_v19, %v4590_v19 }
  0xab   :  { %3469 = vmatprep.subr.bf16.mxu1 %v3748_v25  ;;  %v737_v25 = vcombine.high %v727_v22, %v727_v22 }
  0xac   :  { %3448 = vmatpush3.bf16.msra.mxu0 %v3749_v26  ;;  %v713_v26 = vrot.slane %v697_v14, %v3986_v41 }
  0xad   :  { %3449 = vmatprep.subr.bf16.mxu0 %v3751_v28  ;;  %v3803_v28 = vld [vmem:[%s4714_s1 + $0x680] sm:$0xff]  }
  0xae   :  { %3470 = vmatpush3.bf16.msra.mxu1 %v3750_v27  ;;  %v3804_v27 = vld [vmem:[%s4714_s1 + $0x778] sm:$0xff]  }
  0xaf   :  { %3471 = vmatprep.subr.bf16.mxu1 %v3752_v29  ;;  %v734_v29 = vrot.slane %v706_v23, %v3986_v41 }
  0xb0   :  { %3450 = vmatpush3.bf16.msra.mxu0 %v3753_v30  ;;  %v3805_v30 = vld [vmem:[%s4714_s1 + $0x7f8] sm:$0xff]  }
  0xb1   :  { %3451 = vmatprep.subr.bf16.mxu0 %v3755_v32  ;;  %v735_v32 = vcombine.high %v713_v26, %v713_v26 }
  0xb2   :  { %3472 = vmatpush3.bf16.msra.mxu1 %v3754_v31  ;;  %v3806_v31 = vld [vmem:[%s4714_s1 + $0x738] sm:$0xff]  }
  0xb3   :  { %3473 = vmatprep.subr.bf16.mxu1 %v3756_v33  ;;  %v3808_v33 = vld [vmem:[%s4714_s1 + $0x770] sm:$0xff]  }
  0xb4   :  { %3452 = vmatpush3.bf16.msra.mxu0 %v3757_v34  ;;  %v3807_v34 = vld [vmem:[%s4714_s1 + $0x7b8] sm:$0xff]  }
  0xb5   :  { %3453 = vmatprep.subr.bf16.mxu0 %v3759_v36 }
  0xb6   :  { %3474 = vmatpush3.bf16.msra.mxu1 %v3758_v35  ;;  %v738_v35 = vcombine.high %v734_v29, %v734_v29 }
  0xb7   :  { %3475 = vmatprep.subr.bf16.mxu1 %v3760_v37  ;;  %v2966_v37 = vld [vmem:[%s4715_s2] ss:$0 sm:$0xff] }
  0xb8   :  { %3454 = vmatpush3.bf16.msra.mxu0 %v3761_v38  ;;  %v3809_v38 = vld [vmem:[%s4714_s1 + $0x7f0] sm:$0xff]  }
  0xb9   :  { %3455 = vmatprep.subr.bf16.mxu0 %v3763_v40 }
  0xba   :  { %3476 = vmatpush3.bf16.msra.mxu1 %v3762_v39  ;;  %v3810_v39 = vld [vmem:[%s4714_s1 + $0x730] sm:$0xff]  }
  0xbb   :  { %3477 = vmatprep.subr.bf16.mxu1 %v3764_v42 }
  0xbc   :  { %3456 = vmatpush3.bf16.msra.mxu0 %v3765_v43  ;;  %v3812_v43 = vld [vmem:[%s4714_s1 + $0x768] sm:$0xff]  }
  0xbd   :  { %3457 = vmatprep.subr.bf16.mxu0 %v3767_v45  ;;  %v3811_v45 = vld [vmem:[%s4714_s1 + $0x7b0] sm:$0xff]  }
  0xbe   :  { %3478 = vmatpush3.bf16.msra.mxu1 %v3766_v44 }
  0xbf   :  { %3479 = vmatprep.subr.bf16.mxu1 %v3768_v46 }
  0xc0   :  { %3458 = vmatpush3.bf16.msra.mxu0 %v3769_v47 }
  0xc1   :  { %3487 = vmatprep.subr.bf16.mxu0 %v3772_v50 }
  0xc2   :  { %3480 = vmatpush3.bf16.msra.mxu1 %v3770_v48  ;;  %v3813_v48 = vld [vmem:[%s4714_s1 + $0x7e8] sm:$0xff]  }
  0xc3   :  { %2740 = vmatmul.mubr.bf16.vlgmr.msra.gmra.mxu0 %v671_v49  ;;  %3509 = vmatprep.subr.bf16.mxu1 %v3773_v51  ;;  %v3814_v51 = vld [vmem:[%s4714_s1 + $0x728] sm:$0xff]  }
  0xc4   :  { %3488 = vmatpush3.bf16.msra.mxu0 %v3774_v52  ;;  %2819 = vmatprep.mubr.bf16.mxu0 %v727_v22 }
  0xc5   :  { %2780 = vmatmul.mubr.bf16.vlgmr.msra.gmra.mxu1 %v687_v54  ;;  %3489 = vmatprep.subr.bf16.mxu0 %v3776_v55  ;;  %v3816_v54 = vld [vmem:[%s4714_s1 + $0x760] sm:$0xff]  }
  0xc6   :  { %3510 = vmatpush3.bf16.msra.mxu1 %v3775_v53  ;;  %2859 = vmatprep.mubr.bf16.mxu1 %v737_v25 }
  0xc7   :  { %3511 = vmatprep.subr.bf16.mxu1 %v3777_v56  ;;  %v3815_v56 = vld [vmem:[%s4714_s1 + $0x7a8] sm:$0xff]  }
  0xc8   :  { %3490 = vmatpush3.bf16.msra.mxu0 %v3778_v57 }
  0xc9   :  { %3491 = vmatprep.subr.bf16.mxu0 %v3780_v59  ;;  %v3818_v59 = vld [vmem:[%s4714_s1 + $0x720] sm:$0xff]  }
  0xca   :  { %3512 = vmatpush3.bf16.msra.mxu1 %v3779_v58  ;;  %v3817_v58 = vld [vmem:[%s4714_s1 + $0x7e0] sm:$0xff]  }
  0xcb   :  { %3513 = vmatprep.subr.bf16.mxu1 %v3781_v60  ;;  %v3820_v60 = vld [vmem:[%s4714_s1 + $0x758] sm:$0xff]  }
  0xcc   :  { %3492 = vmatpush3.bf16.msra.mxu0 %v3782_v61  ;;  %v3819_v61 = vld [vmem:[%s4714_s1 + $0x7a0] sm:$0xff]  }
  0xcd   :  { %3493 = vmatprep.subr.bf16.mxu0 %v3784_v63  ;;  %v3822_v63 = vld [vmem:[%s4714_s1 + $0x718] sm:$0xff]  }
  0xce   :  { %3514 = vmatpush3.bf16.msra.mxu1 %v3783_v62  ;;  %v3821_v62 = vld [vmem:[%s4714_s1 + $0x7d8] sm:$0xff]  }
  0xcf   :  { %3515 = vmatprep.subr.bf16.mxu1 %v3785_v0  ;;  %v3824_v0 = vld [vmem:[%s4714_s1 + $0x750] sm:$0xff]  }
  0xd0   :  { %3494 = vmatpush3.bf16.msra.mxu0 %v3786_v1  ;;  %v3823_v1 = vld [vmem:[%s4714_s1 + $0x798] sm:$0xff]  }
  0xd1   :  { %3495 = vmatprep.subr.bf16.mxu0 %v3788_v3  ;;  %v3826_v3 = vld [vmem:[%s4714_s1 + $0x710] sm:$0xff]  }
  0xd2   :  { %3516 = vmatpush3.bf16.msra.mxu1 %v3787_v2  ;;  %v3825_v2 = vld [vmem:[%s4714_s1 + $0x7d0] sm:$0xff]  }
  0xd3   :  { %3517 = vmatprep.subr.bf16.mxu1 %v3789_v4  ;;  %v3828_v4 = vld [vmem:[%s4714_s1 + $0x748] sm:$0xff]  }
  0xd4   :  { %3496 = vmatpush3.bf16.msra.mxu0 %v3790_v5  ;;  %v3827_v5 = vld [vmem:[%s4714_s1 + $0x790] sm:$0xff]  }
  0xd5   :  { %3497 = vmatprep.subr.bf16.mxu0 %v3792_v7 }
  0xd6   :  { %3518 = vmatpush3.bf16.msra.mxu1 %v3791_v6 }
  0xd7   :  { %3519 = vmatprep.subr.bf16.mxu1 %v3793_v8 }
  0xd8   :  { %3498 = vmatpush3.bf16.msra.mxu0 %v3794_v9 }
  0xd9   :  { %3499 = vmatprep.subr.bf16.mxu0 %v3796_v11 }
  0xda   :  { %3520 = vmatpush3.bf16.msra.mxu1 %v3795_v10 }
  0xdb   :  { %3521 = vmatprep.subr.bf16.mxu1 %v3797_v13 }
  0xdc   :  { %3500 = vmatpush3.bf16.msra.mxu0 %v3798_v16 }
  0xdd   :  { %3501 = vmatprep.subr.bf16.mxu0 %v3800_v17 }
  0xde   :  { %3522 = vmatpush3.bf16.msra.mxu1 %v3799_v20 }
  0xdf   :  { %3523 = vmatprep.subr.bf16.mxu1 %v3801_v21 }
  0xe0   :  { %3502 = vmatpush3.bf16.msra.mxu0 %v3802_v24 }
  0xe1   :  { %3531 = vmatprep.subr.bf16.mxu0 %v3804_v27 }
  0xe2   :  { %3524 = vmatpush3.bf16.msra.mxu1 %v3803_v28 }
  0xe3   :  { %v3239_v36 = vpop.f32.mrf.mxu0  ;;  %2820 = vmatmul.mubr.bf16.vlgmr.msra.gmra.mxu0 %v713_v26  ;;  %3553 = vmatprep.subr.bf16.mxu1 %v3805_v30 }
  0xe4   :  { %3532 = vmatpush3.bf16.msra.mxu0 %v3806_v31  ;;  %2899 = vmatprep.mubr.bf16.mxu0 %v734_v29  ;;  %v3261_v40 = vpop.f32.mrf.mxu1 }
  0xe5   :  { %2860 = vmatmul.mubr.bf16.vlgmr.msra.gmra.mxu1 %v735_v32  ;;  %v3240_v42 = vpop.f32.mrf.mxu0  ;;  %3533 = vmatprep.subr.bf16.mxu0 %v3808_v33 }
  0xe6   :  { %3554 = vmatpush3.bf16.msra.mxu1 %v3807_v34  ;;  %v3241_v44 = vadd.f32 %v3240_v42, %v3239_v36  ;;  %2939 = vmatprep.mubr.bf16.mxu1 %v738_v35  ;;  %v3262_v46 = vpop.f32.mrf.mxu1 }
  0xe7   :  { %v3242_v47 = vpop.f32.mrf.mxu0  ;;  %3555 = vmatprep.subr.bf16.mxu1 %v3809_v38  ;;  %v3263_v50 = vadd.f32 %v3262_v46, %v3261_v40 }
  0xe8   :  { %v2342_v49 = vadd.f32 %v3241_v44, %v2966_v37  ;;  %3534 = vmatpush3.bf16.msra.mxu0 %v3810_v39  ;;  %v3264_v52 = vpop.f32.mrf.mxu1 }
  0xe9   :  { %v3243_v53 = vpop.f32.mrf.mxu0  ;;  %3535 = vmatprep.subr.bf16.mxu0 %v3812_v43 }
  0xea   :  { %v2382_v55 = vadd.f32 %v3263_v50, %v2342_v49  ;;  %3556 = vmatpush3.bf16.msra.mxu1 %v3811_v45  ;;  %v3265_v57 = vpop.f32.mrf.mxu1 }
  0xeb   :  { %3557 = vmatprep.subr.bf16.mxu1 %v3813_v48 }
  0xec   :  { %3536 = vmatpush3.bf16.msra.mxu0 %v3814_v51 }
  0xed   :  { %3537 = vmatprep.subr.bf16.mxu0 %v3816_v54 }
  0xee   :  { %3558 = vmatpush3.bf16.msra.mxu1 %v3815_v56 }
  0xef   :  { %3559 = vmatprep.subr.bf16.mxu1 %v3817_v58 }
  0xf0   :  { %3538 = vmatpush3.bf16.msra.mxu0 %v3818_v59 }
  0xf1   :  { %3539 = vmatprep.subr.bf16.mxu0 %v3820_v60 }
  0xf2   :  { %3560 = vmatpush3.bf16.msra.mxu1 %v3819_v61 }
  0xf3   :  { %3561 = vmatprep.subr.bf16.mxu1 %v3821_v62 }
  0xf4   :  { %3540 = vmatpush3.bf16.msra.mxu0 %v3822_v63 }
  0xf5   :  { %3541 = vmatprep.subr.bf16.mxu0 %v3824_v0 }
  0xf6   :  { %3562 = vmatpush3.bf16.msra.mxu1 %v3823_v1 }
  0xf7   :  { %8 = vsyncpa [#allocation3], 0  ;;  %3563 = vmatprep.subr.bf16.mxu1 %v3825_v2  ;;  %v3829_v6 = vld [vmem:[%s4714_s1 + $0x7c8] sm:$0xff]   ;;  %v3832_v8 = vld [vmem:[%s4714_s1 + $0x740] sm:$0xff]   ;;  %v720_v12 = vrot.slane %v4590_v19, %v3986_v41  ;;  %vm2950_vm0 = vcmask 58368  }
  0xf8   :  { %3542 = vmatpush3.bf16.msra.mxu0 %v3826_v3  ;;  %v3830_v7 = vld [vmem:[%s4714_s1 + $0x708] sm:$0xff]   ;;  %v3833_v10 = vld [vmem:[%s4714_s1 + $0x7c0] sm:$0xff]  }
  0xf9   :  { %3543 = vmatprep.subr.bf16.mxu0 %v3828_v4  ;;  %v3831_v9 = vld [vmem:[%s4714_s1 + $0x788] sm:$0xff]   ;;  %v3834_v11 = vld [vmem:[%s4714_s1 + $0x700] sm:$0xff]   ;;  %v736_v14 = vcombine.high %v720_v12, %v720_v12 }
  0xfa   :  { %3564 = vmatpush3.bf16.msra.mxu1 %v3827_v5  ;;  %v3835_v13 = vld [vmem:[%s4714_s1 + $0x780] sm:$0xff]   ;;  %s3860_s1 = smov [#allocation2]  }
  0xfb   :  { %3565 = vmatprep.subr.bf16.mxu1 %v3829_v6  ;;  %s2958_s16 = sshll.u32 %s3860_s1, 4  ;;  %s2959_s16 = int_to_ptr.vmem [resolvable:$true] %s2958_s16 }
  0xfc   :  { %3544 = vmatpush3.bf16.msra.mxu0 %v3830_v7  ;;  %s3837_s17 = scalar_lea.vmem %s2959_s16, 32  ;;  %p3842_p1 = scmp.lt.s32.totalorder %s2959_s16, %s2959_s16 }
  0xfd   :  { %3545 = vmatprep.subr.bf16.mxu0 %v3832_v8  ;;  %p3838_p0 = scmp.ne.s32.totalorder %s2959_s16, %s3837_s17  ;;  %p3843_p2 = scmp.lt.s32.totalorder %s3837_s17, %s3837_s17 }
  0xfe   :  { %3566 = vmatpush3.bf16.msra.mxu1 %v3831_v9 }
  0xff   :  { %3567 = vmatprep.subr.bf16.mxu1 %v3833_v10  ;;  %p3844_p3 = por %p3843_p2, %p3842_p1 }
 0x100   :  { %3546 = vmatpush3.bf16.msra.mxu0 %v3834_v11 }
 0x101   :  { %p3845_p4 = pnand %p3844_p3, %p3838_p0 }
 0x102   :  { %3568 = vmatpush3.bf16.msra.mxu1 %v3835_v13 }
 0x103   :  { %v3283_v15 = vpop.f32.mrf.mxu0  ;;  %2900 = vmatmul.mubr.bf16.vlgmr.msra.gmra.mxu0 %v720_v12 }
 0x104   :  { %v3305_v16 = vpop.f32.mrf.mxu1 }
 0x105   :  { %2940 = vmatmul.mubr.bf16.vlgmr.msra.gmra.mxu1 %v736_v14  ;;  %v3284_v17 = vpop.f32.mrf.mxu0 }
 0x106   :  { %v3285_v18 = vadd.f32 %v3284_v17, %v3283_v15  ;;  %v3306_v20 = vpop.f32.mrf.mxu1 }
 0x107   :  { %v3286_v21 = vpop.f32.mrf.mxu0  ;;  %v3307_v23 = vadd.f32 %v3306_v20, %v3305_v16 }
 0x108   :  { %v2422_v22 = vadd.f32 %v3285_v18, %v2382_v55  ;;  %v3308_v41 = vpop.f32.mrf.mxu1 }
 0x109   :  { %v3287_v19 = vpop.f32.mrf.mxu0 }
 0x10a   :  { %v2462_v24 = vadd.f32 %v3307_v23, %v2422_v22  ;;  %v3309_v25 = vpop.f32.mrf.mxu1 }
 0x123   :  { %v3327_v26 = vpop.f32.mrf.mxu0 }
 0x125   :  { %v3349_v27 = vpop.f32.mrf.mxu1  ;;  %v3328_v28 = vpop.f32.mrf.mxu0 }
 0x126   :  { %v3329_v29 = vadd.f32 %v3328_v28, %v3327_v26 }
 0x127   :  { %v3350_v30 = vpop.f32.mrf.mxu1  ;;  %v3330_v31 = vpop.f32.mrf.mxu0 }
 0x128   :  { %v2502_v32 = vadd.f32 %v3329_v29, %v2462_v24  ;;  %v3351_v33 = vadd.f32 %v3350_v30, %v3349_v27 }
 0x129   :  { %v3352_v34 = vpop.f32.mrf.mxu1  ;;  %v3331_v35 = vpop.f32.mrf.mxu0 }
 0x12a   :  { %v2542_v36 = vadd.f32 %v3351_v33, %v2502_v32 }
 0x12b   :  { %v3353_v37 = vpop.f32.mrf.mxu1 }
 0x143   :  { %v3371_v38 = vpop.f32.mrf.mxu0 }
 0x145   :  { %v3393_v39 = vpop.f32.mrf.mxu1  ;;  %v3372_v40 = vpop.f32.mrf.mxu0 }
 0x146   :  { %v3373_v42 = vadd.f32 %v3372_v40, %v3371_v38 }
 0x147   :  { %v3394_v43 = vpop.f32.mrf.mxu1  ;;  %v3374_v44 = vpop.f32.mrf.mxu0 }
 0x148   :  { %v2582_v45 = vadd.f32 %v3373_v42, %v2542_v36  ;;  %v3395_v46 = vadd.f32 %v3394_v43, %v3393_v39 }
 0x149   :  { %v3396_v47 = vpop.f32.mrf.mxu1  ;;  %v3375_v48 = vpop.f32.mrf.mxu0 }
 0x14a   :  { %v2622_v49 = vadd.f32 %v3395_v46, %v2582_v45 }
 0x14b   :  { %v3397_v50 = vpop.f32.mrf.mxu1 }
 0x163   :  { %v3415_v51 = vpop.f32.mrf.mxu0 }
 0x165   :  { %v3437_v52 = vpop.f32.mrf.mxu1  ;;  %v3416_v53 = vpop.f32.mrf.mxu0 }
 0x166   :  { %v3417_v54 = vadd.f32 %v3416_v53, %v3415_v51 }
 0x167   :  { %v3438_v55 = vpop.f32.mrf.mxu1  ;;  %v3418_v56 = vpop.f32.mrf.mxu0 }
 0x168   :  { %v2662_v57 = vadd.f32 %v3417_v54, %v2622_v49  ;;  %v3439_v58 = vadd.f32 %v3438_v55, %v3437_v52 }
 0x169   :  { %v3440_v59 = vpop.f32.mrf.mxu1  ;;  %v3419_v60 = vpop.f32.mrf.mxu0 }
 0x16a   :  { %v2702_v61 = vadd.f32 %v3439_v58, %v2662_v57 }
 0x16b   :  { %v3441_v62 = vpop.f32.mrf.mxu1 }
 0x183   :  { %v3459_v63 = vpop.f32.mrf.mxu0 }
 0x185   :  { %v3481_v0 = vpop.f32.mrf.mxu1  ;;  %v3460_v1 = vpop.f32.mrf.mxu0 }
 0x186   :  { %v3461_v15 = vadd.f32 %v3460_v1, %v3459_v63 }
 0x187   :  { %v3482_v2 = vpop.f32.mrf.mxu1  ;;  %v3462_v3 = vpop.f32.mrf.mxu0 }
 0x188   :  { %v2742_v16 = vadd.f32 %v3461_v15, %v2702_v61  ;;  %v3483_v17 = vadd.f32 %v3482_v2, %v3481_v0 }
 0x189   :  { %v3484_v4 = vpop.f32.mrf.mxu1  ;;  %v3463_v5 = vpop.f32.mrf.mxu0 }
 0x18a   :  { %v2782_v20 = vadd.f32 %v3483_v17, %v2742_v16 }
 0x18b   :  { %v3485_v6 = vpop.f32.mrf.mxu1 }
 0x1a3   :  { %v3503_v7 = vpop.f32.mrf.mxu0 }
 0x1a5   :  { %v3525_v8 = vpop.f32.mrf.mxu1  ;;  %v3504_v9 = vpop.f32.mrf.mxu0 }
 0x1a6   :  { %v3505_v18 = vadd.f32 %v3504_v9, %v3503_v7 }
 0x1a7   :  { %v3526_v10 = vpop.f32.mrf.mxu1  ;;  %v3506_v11 = vpop.f32.mrf.mxu0 }
 0x1a8   :  { %v2822_v21 = vadd.f32 %v3505_v18, %v2782_v20  ;;  %v3527_v22 = vadd.f32 %v3526_v10, %v3525_v8 }
 0x1a9   :  { %v3528_v12 = vpop.f32.mrf.mxu1  ;;  %v3507_v13 = vpop.f32.mrf.mxu0 }
 0x1aa   :  { %v2862_v24 = vadd.f32 %v3527_v22, %v2822_v21 }
 0x1ab   :  { %v3529_v14 = vpop.f32.mrf.mxu1 }
 0x1c3   :  { %v3547_v23 = vpop.f32.mrf.mxu0 }
 0x1c5   :  { %v3569_v41 = vpop.f32.mrf.mxu1  ;;  %v3548_v19 = vpop.f32.mrf.mxu0 }
 0x1c6   :  { %v3549_v25 = vadd.f32 %v3548_v19, %v3547_v23 }
 0x1c7   :  { %v3570_v26 = vpop.f32.mrf.mxu1  ;;  %v3550_v27 = vpop.f32.mrf.mxu0 }
 0x1c8   :  { %v2902_v28 = vadd.f32 %v3549_v25, %v2862_v24  ;;  %v3571_v29 = vadd.f32 %v3570_v26, %v3569_v41 }
 0x1c9   :  { %v3572_v30 = vpop.f32.mrf.mxu1  ;;  %v3551_v31 = vpop.f32.mrf.mxu0 }
 0x1ca   :  { %v2942_v32 = vadd.f32 %v3571_v29, %v2902_v28 }
 0x1cb   :  { %v3573_v33 = vpop.f32.mrf.mxu1 }
 0x1cc   :  { %v2947_v34 = vmin.f32 %v2942_v32, 6.0 }
 0x1ce   :  { %v2948_v35 = vmax.f32 %v2947_v34, 0.0 }
 0x1d0   :  { %v2949_v36 = vmul.f32 0.16666667, %v2948_v35 }
 0x1d2   :  { %2951 = vst.msk [vmem:[#allocation2] sm:$0x3] %vm2950_vm0, %v2949_v36 }
 0x1d3   :  { %3848 = shalt.err (!%p3845_p4)
}
 0x1d4   :  { %2961 = dma.vmem_to_hbm [thread:$0]  %s2959_s16, 32, %s4716_s3, [#allocation3]  }
 0x1d5   :  { %3857 = dma.done.wait [#allocation3], 32  }
 0x1d6   :  { %3858 = vsyncadd [#allocation3], 4294967264 }
 0x1d7   :  { %2965 = vsyncpa [#allocation3], 1 }

</bundles_post_ra>
